<compile_context>
chip_gen: v6e
topology: v6e:2x2x1
jax: 0.10.0
libtpu: 0.0.40
codegen_flags: <defaults>
</compile_context>

<pallas_src>
import jax
import jax.numpy as jnp
from jax import lax
from jax.experimental import pallas as pl
from jax.experimental.pallas import tpu as pltpu


def _round_up(x, m):
    return ((x + m - 1) // m) * m


def _vmem_budget(*nbytes):
    # double-buffered blocks + 1 MiB headroom, clamped to a sane range.
    need = 2 * sum(int(n) for n in nbytes) + (1 << 20)
    return int(min(max(need, 4 << 20), 64 << 20))


# ---------------------------------------------------------------------------
# Kernel 1: linear projection  projected = pooled @ W   (bias folded in later)
# ---------------------------------------------------------------------------
def projection_kernel(pooled_ref, w_ref, proj_ref):
    # bf16 operands, f32 MXU accumulate, bf16 result (intentional precision choice).
    proj_ref[...] = jnp.dot(
        pooled_ref[...], w_ref[...], preferred_element_type=jnp.float32
    ).astype(jnp.bfloat16)


# ---------------------------------------------------------------------------
# Kernel 2: per-batch-row segment gather as a one-hot MXU matmul + bias add
#   seg_ref : (T, 1)      int32   segment id per position of this batch row
#   proj_ref: (n_pad, D)  bf16    VMEM-resident projected segment table
#   bias_ref: (1, D)      f32
#   o_ref   : (T, D)      f32     lane-dense output slab for this batch row
# ---------------------------------------------------------------------------
def gather_kernel(seg_ref, proj_ref, bias_ref, o_ref):
    n_pad = proj_ref.shape[0]
    T = o_ref.shape[0]
    seg = seg_ref[...]                                            # (T, 1) int32
    col_ids = lax.broadcasted_iota(jnp.int32, (T, n_pad), 1)      # segment index s
    onehot = (seg == col_ids).astype(jnp.bfloat16)                # (T, n_pad) bf16
    gathered = jnp.dot(onehot, proj_ref[...],
                       preferred_element_type=jnp.float32)        # (T, D) on MXU
    o_ref[...] = gathered + bias_ref[...]                         # bias in epilogue


def bert_project_and_expand(seg_index, pooled, w, b):
    """out[bi, t, :] = (pooled @ w + b)[seg_index[bi, t], :]  via two Pallas calls."""
    B, T = seg_index.shape
    n_seg, H = pooled.shape
    D = w.shape[1]

    # --- pad to TPU-friendly shapes (zero padding -> numerically identical) ---
    n_pad = _round_up(max(n_seg, 8), 8)          # sublane multiple
    H_pad = _round_up(max(H, 128), 128)          # MXU contraction depth
    D_pad = _round_up(max(D, 128), 128)          # lane-dense output stores

    pooled_bf = jnp.zeros((n_pad, H_pad), jnp.bfloat16).at[:n_seg, :H].set(
        pooled.astype(jnp.bfloat16))
    w_bf = jnp.zeros((H_pad, D_pad), jnp.bfloat16).at[:H, :D].set(
        w.astype(jnp.bfloat16))
    b_f32 = jnp.zeros((1, D_pad), jnp.float32).at[:, :D].set(
        b.reshape(1, D).astype(jnp.float32))

    # ---- kernel 1: projection (single tiled matmul, computed exactly once) ----
    tm = min(n_pad, 512)
    projected = pl.pallas_call(
        projection_kernel,
        out_shape=jax.ShapeDtypeStruct((n_pad, D_pad), jnp.bfloat16),
        grid_spec=pltpu.PrefetchScalarGridSpec(
            num_scalar_prefetch=0,
            grid=(pl.cdiv(n_pad, tm),),
            in_specs=[
                pl.BlockSpec((tm, H_pad), lambda i: (i, 0)),
                pl.BlockSpec((H_pad, D_pad), lambda i: (0, 0)),
            ],
            out_specs=pl.BlockSpec((tm, D_pad), lambda i: (i, 0)),
        ),
        compiler_params=pltpu.CompilerParams(
            dimension_semantics=("parallel",),
            vmem_limit_bytes=_vmem_budget(
                tm * H_pad * 2, H_pad * D_pad * 2, tm * D_pad * 2),
        ),
    )(pooled_bf, w_bf)

    # ---- kernel 2: one-hot gather + bias, one (T, D) slab per batch row ----
    seg_col = seg_index.astype(jnp.int32)[:, :, None]            # (B, T, 1)
    # For production sizes: tile T into the grid (grid=(B, T//tT)) and mark the
    # constant-index inputs pipeline_mode=pl.Buffered(1) to trim VMEM further.
    out = pl.pallas_call(
        gather_kernel,
        out_shape=jax.ShapeDtypeStruct((B, T, D_pad), jnp.float32),
        grid_spec=pltpu.PrefetchScalarGridSpec(
            num_scalar_prefetch=0,
            grid=(B,),
            in_specs=[
                pl.BlockSpec((None, T, 1), lambda bi: (bi, 0, 0)),    # seg ids
                pl.BlockSpec((n_pad, D_pad), lambda bi: (0, 0)),      # projected (const)
                pl.BlockSpec((1, D_pad), lambda bi: (0, 0)),          # bias (const)
            ],
            out_specs=pl.BlockSpec((None, T, D_pad), lambda bi: (bi, 0, 0)),
        ),
        compiler_params=pltpu.CompilerParams(
            dimension_semantics=("parallel",),   # v7x: batch rows shard over 2 TCs
            vmem_limit_bytes=_vmem_budget(
                T * 4, n_pad * D_pad * 2, D_pad * 4, T * D_pad * 4),
        ),
    )(seg_col, projected, b_f32)

    return out[..., :D]


# ---------------------------------------------------------------------------
# Host-side glue: consecutive-dedup of token strings (mirrors the PyTorch loop)
# ---------------------------------------------------------------------------
def build_segments(inputs):
    """Returns (segments_flat, seg_index[B,T]) mimicking the forward's dedup logic.

    Note: mirrors the reference semantics exactly — leading '[PAD]' positions keep
    index 0 and mid-sequence '[PAD]' positions inherit the previous segment's index.
    """
    B = len(inputs)
    T = len(inputs[0])
    segments_flat = []
    seg_index = []
    for i in range(B):
        text = inputs[i]
        transcripts, idx_list = [], []
        pre = None
        for idx, t in enumerate(text):
            if t == '[PAD]':
                pass
            elif pre != t:
                transcripts.append(t)
                idx_list.append(idx)
                pre = t
        idx_list.append(len(text))
        start = len(segments_flat)
        segments_flat += transcripts
        row = [0] * T
        for j in range(len(transcripts)):
            for p in range(idx_list[j], idx_list[j + 1]):
                row[p] = start + j
        seg_index.append(row)
    return segments_flat, jnp.asarray(seg_index, dtype=jnp.int32)


if __name__ == "__main__":
    # Small toy shapes: batch=2, seq=8, bert_hidden_dim=32, semantic_encoding_dim=128.
    B, T, H, D = 2, 8, 32, 128

    inputs = [
        ["a", "a", "b", "b", "b", "[PAD]", "c", "c"],
        ["x", "y", "y", "y", "z", "z", "z", "z"],
    ]
    segments_flat, seg_index = build_segments(inputs)
    n_seg = len(segments_flat)

    key = jax.random.PRNGKey(0)
    k1, k2, k3 = jax.random.split(key, 3)

    # Synthetic stand-in for BERT pooled_output (one feature row per deduped segment).
    pooled = jax.random.normal(k1, (n_seg, H), dtype=jnp.float32)
    # nn.Linear(bert_hidden_dim, semantic_encoding_dim) parameters.
    w = jax.random.normal(k2, (H, D), dtype=jnp.float32) * 0.02
    b = jax.random.normal(k3, (1, D), dtype=jnp.float32) * 0.02

    out = bert_project_and_expand(seg_index, pooled, w, b)   # [B, T, D]
    out = jax.block_until_ready(out)

    # Pure-JAX reference (same bf16-operand / f32-accumulate / bf16-projected recipe).
    proj = jnp.dot(pooled.astype(jnp.bfloat16), w.astype(jnp.bfloat16),
                   preferred_element_type=jnp.float32).astype(jnp.bfloat16)
    ref = proj.astype(jnp.float32)[seg_index] + b            # [B, T, D]

    assert out.shape == (B, T, D)
    assert jnp.allclose(out, ref, atol=2e-2, rtol=2e-2), "mismatch vs reference"

    print("KERNEL_OK")
</pallas_src>

<mosaic_0001>
module attributes {stable_mosaic.version = 11 : i64} {
  func.func @projection_kernel(%arg0: i32, %arg1: memref<8x128xbf16, #tpu.memory_space<vmem>>, %arg2: memref<128x128xbf16, #tpu.memory_space<vmem>>, %arg3: memref<8x128xbf16, #tpu.memory_space<vmem>>) attributes {dimension_semantics = [#tpu.dimension_semantics<parallel>], iteration_bounds = array<i64: 1>, scalar_prefetch = 0 : i64, scratch_operands = 0 : i64, tpu.core_type = #tpu.core_type<tc>, window_params = [{transform_indices = @transform_0, window_bounds = array<i64: 8, 128>}, {pipeline_mode = #tpu.pipeline_mode<synchronous>, transform_indices = @transform_1, window_bounds = array<i64: 128, 128>}, {transform_indices = @transform_2, window_bounds = array<i64: 8, 128>}]} {
    %c0 = arith.constant 0 : index
    %c0_0 = arith.constant 0 : index
    %0 = vector.load %arg1[%c0, %c0_0] : memref<8x128xbf16, #tpu.memory_space<vmem>>, vector<8x128xbf16>
    %c0_1 = arith.constant 0 : index
    %c0_2 = arith.constant 0 : index
    %1 = vector.load %arg2[%c0_1, %c0_2] : memref<128x128xbf16, #tpu.memory_space<vmem>>, vector<128x128xbf16>
    %cst = arith.constant dense<0.000000e+00> : vector<8x128xf32>
    %2 = tpu.matmul %0, %1, %cst {dimension_numbers = #tpu.dot_dimension_numbers<[1], [0], [0], [1], [0, 0, 1, 1], [], []>} : vector<8x128xbf16>, vector<128x128xbf16>, vector<8x128xf32> -> vector<8x128xf32>
    %3 = arith.truncf %2 : vector<8x128xf32> to vector<8x128xbf16>
    %c0_3 = arith.constant 0 : index
    %c0_4 = arith.constant 0 : index
    %4 = vector.load %arg3[%c0_3, %c0_4] : memref<8x128xbf16, #tpu.memory_space<vmem>>, vector<8x128xbf16>
    tpu.vector_store %arg3[%c0_3, %c0_4], %3 {strides = array<i32>} : memref<8x128xbf16, #tpu.memory_space<vmem>>, vector<8x128xbf16>,
    return
  }
  func.func @transform_0(%arg0: i32) -> (i32, i32) {
    %c0_i32 = arith.constant 0 : i32
    %c0_i32_0 = arith.constant 0 : i32
    return %arg0, %c0_i32 : i32, i32
  }
  func.func @transform_1(%arg0: i32) -> (i32, i32) {
    %c0_i32 = arith.constant 0 : i32
    %c0_i32_0 = arith.constant 0 : i32
    %c0_i32_1 = arith.constant 0 : i32
    return %c0_i32, %c0_i32_0 : i32, i32
  }
  func.func @transform_2(%arg0: i32) -> (i32, i32) {
    %c0_i32 = arith.constant 0 : i32
    %c0_i32_0 = arith.constant 0 : i32
    return %arg0, %c0_i32 : i32, i32
  }
}

</mosaic_0001>

<bundles_post_ra>
// kernel: tpu_custom_call.1
= control target key start
LH: loop header
LB: loop body
LE: loop exit
PB: predicated region body
PF: predicated region fallthrough
CT: control target
= control target key end

     0   :  { %7 = vsyncpa [#allocation3], 0  ;;  %s311_s0 = inlined_call_operand.hbm [shape: bf16[8,128], index: 0, kind: input, shape index: {}]   ;;  %s312_s1 = inlined_call_operand.hbm [shape: bf16[128,128], index: 1, kind: input, shape index: {}]   ;;  %s313_s2 = inlined_call_operand.hbm [shape: bf16[8,128], index: 2, kind: output, shape index: {}]  }
   0x1   :  { %8 = vsyncpa [#allocation6], 0 }
   0x2   :  { %9 = vsyncpa [#allocation4], 0  ;;  %s280_s9 = smov [#allocation2]   ;;  %s281_s11 = smov [#allocation5]  }
   0x3   :  { %s16_s10 = sshll.u32 %s280_s9, 4  ;;  %s25_s12 = sshll.u32 %s281_s11, 4  ;;  %s17_s10 = int_to_ptr.vmem [resolvable:$true] %s16_s10  ;;  %s26_s12 = int_to_ptr.vmem [resolvable:$true] %s25_s12 }
   0x4   :  { %s222_s13 = scalar_lea.vmem %s17_s10, 64  ;;  %p227_p1 = scmp.lt.s32.totalorder %s17_s10, %s17_s10 }
   0x5   :  { %p223_p0 = scmp.ne.s32.totalorder %s17_s10, %s222_s13  ;;  %p228_p2 = scmp.lt.s32.totalorder %s222_s13, %s222_s13 }
   0x7   :  { %p229_p3 = por %p228_p2, %p227_p1 }
   0x9   :  { %p230_p4 = pnand %p229_p3, %p223_p0 }
   0xb   :  { %233 = shalt.err (!%p230_p4)
}
   0xc   :  { %19 = dma.hbm_to_vmem [thread:$0]  %s311_s0, 64, %s17_s10, [#allocation3]  }
   0xd   :  { %s242_s16 = scalar_lea.vmem %s26_s12, 1024  ;;  %p247_p6 = scmp.lt.s32.totalorder %s26_s12, %s26_s12 }
   0xe   :  { %p243_p5 = scmp.ne.s32.totalorder %s26_s12, %s242_s16  ;;  %p248_p7 = scmp.lt.s32.totalorder %s242_s16, %s242_s16 }
  0x10   :  { %p249_p8 = por %p248_p7, %p247_p6 }
  0x12   :  { %p250_p9 = pnand %p249_p8, %p243_p5 }
  0x14   :  { %253 = shalt.err (!%p250_p9)
}
  0x15   :  { %s282_s17 = smov 64   ;;  %s283_s18 = smov 4  }
  0x16   :  { %31 = dma.hbm_to_vmem [thread:$0]  %s312_s1, 1024, %s26_s12, [#allocation6], %s282_s17, %s282_s17, %s283_s18  }
  0x17   :  { %274 = dma.done.wait [#allocation3], 64  }
  0x18   :  { %275 = vsyncadd [#allocation3], 4294967232 }
  0x19   :  { %276 = dma.done.wait [#allocation6], 1024  }
  0x1a   :  { %277 = vsyncadd [#allocation6], 4294966272  ;;  %v284_v0 = vmov 0.0   ;;  %vm285_vm0 = vmmov 0   ;;  %v206_v1 = vld [vmem:[#allocation5 + $0x38] sm:$0xff]   ;;  %v207_v2 = vld [vmem:[#allocation5 + $0x30] sm:$0xff]  }
  0x1b   :  { %179 = vmatprep.subr.bf16.mxu0 %v284_v0  ;;  %195 = vmatprep.mubr.msk.bf16.mxu0 %vm285_vm0, %v284_v0  ;;  %v208_v3 = vld [vmem:[#allocation5 + $0x28] sm:$0xff]   ;;  %v209_v4 = vld [vmem:[#allocation5 + $0x20] sm:$0xff]   ;;  %v210_v5 = vld [vmem:[#allocation5 + $0x18] sm:$0xff]   ;;  %s286_s0 = smov [#allocation7]  }
  0x1c   :  { %180 = vmatpush3.bf16.msra.mxu0 %v206_v1  ;;  %v211_v6 = vld [vmem:[#allocation5 + $0x10] sm:$0xff]   ;;  %v212_v7 = vld [vmem:[#allocation5 + $0x8] sm:$0xff]   ;;  %v213_v8 = vld [vmem:[#allocation5] sm:$0xff]   ;;  %s152_s1 = sshll.u32 %s286_s0, 4  ;;  %s153_s1 = int_to_ptr.vmem [resolvable:$true] %s152_s1 }
  0x1d   :  { %181 = vmatprep.subr.bf16.mxu0 %v284_v0  ;;  %v39_v9 = vld [vmem:[#allocation2] sm:$0xf]  ;;  %s254_s21 = scalar_lea.vmem %s153_s1, 64  ;;  %p259_p11 = scmp.lt.s32.totalorder %s153_s1, %s153_s1 }
  0x1e   :  { %p255_p10 = scmp.ne.s32.totalorder %s153_s1, %s254_s21  ;;  %p260_p12 = scmp.lt.s32.totalorder %s254_s21, %s254_s21 }
  0x20   :  { %182 = vmatpush3.bf16.msra.mxu0 %v207_v2  ;;  %p261_p13 = por %p260_p12, %p259_p11 }
  0x21   :  { %183 = vmatprep.subr.bf16.mxu0 %v284_v0 }
  0x22   :  { %p262_p0 = pnand %p261_p13, %p255_p10 }
  0x24   :  { %184 = vmatpush3.bf16.msra.mxu0 %v208_v3 }
  0x25   :  { %185 = vmatprep.subr.bf16.mxu0 %v284_v0 }
  0x28   :  { %186 = vmatpush3.bf16.msra.mxu0 %v209_v4 }
  0x29   :  { %187 = vmatprep.subr.bf16.mxu0 %v284_v0 }
  0x2c   :  { %188 = vmatpush3.bf16.msra.mxu0 %v210_v5 }
  0x2d   :  { %189 = vmatprep.subr.bf16.mxu0 %v284_v0 }
  0x30   :  { %190 = vmatpush3.bf16.msra.mxu0 %v211_v6 }
  0x31   :  { %191 = vmatprep.subr.bf16.mxu0 %v284_v0 }
  0x34   :  { %192 = vmatpush3.bf16.msra.mxu0 %v212_v7 }
  0x35   :  { %193 = vmatprep.subr.bf16.mxu0 %v284_v0 }
  0x38   :  { %194 = vmatpush3.bf16.msra.mxu0 %v213_v8 }
  0x3b   :  { %196 = vmatmul.mubr.bf16.vlgmr.msra.gmra.mxu0 %v39_v9 }
  0xfb   :  { %v138_v10 = vpop.f32.mrf.mxu0 }
  0xfc   :  { %v144_v11 = vpack.c.bf16 %v138_v10, %v138_v10 }
  0xfd   :  { %v197_v12 = vpop.f32.mrf.mxu0 }
  0xfe   :  { %145 = vst [vmem:[#allocation7] sm:$0xf] %v144_v11 }
  0xff   :  { %v141_v13 = vpop.f32.mrf.mxu0 }
 0x100   :  { %265 = shalt.err (!%p262_p0)
}
 0x101   :  { %155 = dma.vmem_to_hbm [thread:$0]  %s153_s1, 64, %s313_s2, [#allocation4]   ;;  %v198_v14 = vpop.f32.mrf.mxu0 }
 0x102   :  { %278 = dma.done.wait [#allocation4], 64  }
 0x103   :  { %279 = vsyncadd [#allocation4], 4294967232 }
 0x104   :  { %159 = vsyncpa [#allocation3], 1 }
 0x105   :  { %160 = vsyncpa [#allocation6], 1 }
 0x106   :  { %161 = vsyncpa [#allocation4], 1 }

</bundles_post_ra>
